<compile_context>
chip_gen: v5e
topology: v5e:2x2
jax: 0.10.0
libtpu: 0.0.40
codegen_flags: <defaults>
</compile_context>

<pallas_src>
import jax
import jax.numpy as jnp
from jax.experimental import pallas as pl
from jax.experimental.pallas import tpu as pltpu

_LANE = 128      # vreg lane width: hidden/output feature dims padded to this
_SUBLANE = 16    # bf16 packs 2 rows per sublane -> batch tiles are multiples of 16


def _round_up(n, m):
    return ((n + m - 1) // m) * m


def _mlp_kernel(x_ref,
                w1_ref, b1_ref,
                w2_ref, b2_ref,
                w3_ref, b3_ref,
                w4_ref, b4_ref,
                o_ref):
    """Fused 3x(Linear+ReLU) + Linear on one batch tile.

    x arrives as unpadded f32 and is cast to bf16 for the MXU; all dots
    accumulate in f32; bias-add + ReLU run on the VPU in f32; the final store
    is a lane-dense bf16 block."""
    cdt = w1_ref.dtype  # bf16

    h = jnp.dot(x_ref[...].astype(cdt), w1_ref[...],
                preferred_element_type=jnp.float32) + b1_ref[...]
    h = jnp.maximum(h, 0.0)                                       # ReLU (f32)

    h = jnp.dot(h.astype(cdt), w2_ref[...],
                preferred_element_type=jnp.float32) + b2_ref[...]
    h = jnp.maximum(h, 0.0)                                       # ReLU (f32)

    h = jnp.dot(h.astype(cdt), w3_ref[...],
                preferred_element_type=jnp.float32) + b3_ref[...]
    h = jnp.maximum(h, 0.0)                                       # ReLU (f32)

    out = jnp.dot(h.astype(cdt), w4_ref[...],
                  preferred_element_type=jnp.float32) + b4_ref[...]
    o_ref[...] = out.astype(o_ref.dtype)          # no activation on output layer


def prepare_params(params, compute_dtype=jnp.bfloat16):
    """One-time padding/casting of weights & biases (hoisted out of the
    per-call path). Weights are stored (in_features, out_features).

      w1: (in_n,  hid_p) bf16     (K dim left at true size: x is unpadded)
      w2, w3: (hid_p, hid_p) bf16
      w4: (hid_p, out_p) bf16
      b1..b4: (1, hid_p / out_p) f32   (bias-add + ReLU stay f32 on the VPU)

    All padding is with zeros, so results are exact."""
    in_n = params["w1"].shape[0]
    hid_n = params["w1"].shape[1]
    out_n = params["w4"].shape[1]
    hid_p = _round_up(hid_n, _LANE)
    out_p = _round_up(out_n, _LANE)

    def pad2(a, rows, cols, dtype):
        a = jnp.asarray(a, dtype)
        return jnp.pad(a, ((0, rows - a.shape[0]), (0, cols - a.shape[1])))

    return {
        "w1": pad2(params["w1"], in_n, hid_p, compute_dtype),
        "w2": pad2(params["w2"], hid_p, hid_p, compute_dtype),
        "w3": pad2(params["w3"], hid_p, hid_p, compute_dtype),
        "w4": pad2(params["w4"], hid_p, out_p, compute_dtype),
        "b1": pad2(params["b1"], 1, hid_p, jnp.float32),
        "b2": pad2(params["b2"], 1, hid_p, jnp.float32),
        "b3": pad2(params["b3"], 1, hid_p, jnp.float32),
        "b4": pad2(params["b4"], 1, out_p, jnp.float32),
        "in_neurons": in_n,
        "out_neurons": out_n,
    }


def simple_network_forward(x, prepared, *, tile_b=1024):
    """Forward pass. `prepared` comes from prepare_params()."""
    B, in_n = x.shape
    assert in_n == prepared["in_neurons"]
    out_n = prepared["out_neurons"]

    w1, w2, w3, w4 = prepared["w1"], prepared["w2"], prepared["w3"], prepared["w4"]
    b1, b2, b3, b4 = prepared["b1"], prepared["b2"], prepared["b3"], prepared["b4"]
    hid_p = w1.shape[1]
    out_p = w4.shape[1]

    # Minimal batch padding: rows only, to the bf16 sublane tile (zeros, exact).
    b_pad = _round_up(B, _SUBLANE)
    if b_pad != B:
        x = jnp.pad(x, ((0, b_pad - B), (0, 0)))

    # Largest batch tile (multiple of 16) that evenly divides b_pad, capped.
    cap = min(max(_round_up(tile_b, _SUBLANE), _SUBLANE), b_pad)
    tb = _SUBLANE
    for cand in range(cap, _SUBLANE - 1, -_SUBLANE):
        if b_pad % cand == 0:
            tb = cand
            break
    # v7x has 2 TensorCores: ensure >= 2 grid steps whenever we can split.
    if b_pad // tb == 1 and tb % (2 * _SUBLANE) == 0:
        tb //= 2
    grid = (b_pad // tb,)

    def resident(arr):
        # Same block every grid step -> DMA'd once, stays resident in VMEM.
        return pl.BlockSpec(arr.shape, lambda i: (0, 0))

    in_specs = [
        pl.BlockSpec((tb, in_n), lambda i: (i, 0)),   # x: f32, unpadded lanes
        resident(w1), resident(b1),
        resident(w2), resident(b2),
        resident(w3), resident(b3),
        resident(w4), resident(b4),
    ]
    out_spec = pl.BlockSpec((tb, out_p), lambda i: (i, 0))

    param_bytes = sum(int(a.size) * a.dtype.itemsize
                      for a in (w1, w2, w3, w4, b1, b2, b3, b4))
    cost = pl.CostEstimate(
        flops=2 * b_pad * (in_n * hid_p + 2 * hid_p * hid_p + hid_p * out_p),
        transcendentals=0,
        bytes_accessed=int(x.size) * x.dtype.itemsize      # x read
                       + b_pad * out_p * 2                 # bf16 out write
                       + param_bytes,                      # resident params
    )

    out_padded = pl.pallas_call(
        _mlp_kernel,
        out_shape=jax.ShapeDtypeStruct((b_pad, out_p), jnp.bfloat16),
        grid=grid,
        in_specs=in_specs,
        out_specs=out_spec,
        compiler_params=pltpu.CompilerParams(
            dimension_semantics=("parallel",),   # batch axis -> both TCs on v7x
        ),
        cost_estimate=cost,
    )(x, w1, b1, w2, b2, w3, b3, w4, b4)

    # Slice the real batch / output columns back out (padding was zeros).
    return out_padded[:B, :out_n].astype(x.dtype)


def init_params(key, input_neurons, hidden_neurons, output_neurons):
    """Deterministic init mirroring torch.nn.Linear's U(-1/sqrt(fan_in), 1/sqrt(fan_in)).

    Weights are stored already transposed to (in_features, out_features)."""
    dims = [(input_neurons, hidden_neurons),
            (hidden_neurons, hidden_neurons),
            (hidden_neurons, hidden_neurons),
            (hidden_neurons, output_neurons)]
    params = {}
    for i, (fan_in, fan_out) in enumerate(dims, start=1):
        key, kw, kb = jax.random.split(key, 3)
        bound = 1.0 / jnp.sqrt(fan_in)
        params[f"w{i}"] = jax.random.uniform(
            kw, (fan_in, fan_out), jnp.float32, minval=-bound, maxval=bound)
        params[f"b{i}"] = jax.random.uniform(
            kb, (1, fan_out), jnp.float32, minval=-bound, maxval=bound)
    return params


def _reference_forward(x, params, compute_dtype=jnp.bfloat16):
    """Pure-JAX reference on the same numerics path (bf16 dots, f32 accumulate)."""
    def layer(h, w, b):
        return jnp.dot(h.astype(compute_dtype), w.astype(compute_dtype),
                       preferred_element_type=jnp.float32) + b.astype(jnp.float32)
    h = jnp.maximum(layer(x, params["w1"], params["b1"]), 0.0)
    h = jnp.maximum(layer(h, params["w2"], params["b2"]), 0.0)
    h = jnp.maximum(layer(h, params["w3"], params["b3"]), 0.0)
    return layer(h, params["w4"], params["b4"])


if __name__ == "__main__":
    input_neurons, hidden_neurons, output_neurons = 32, 64, 16
    batch = 8

    key = jax.random.PRNGKey(0)
    key, kx = jax.random.split(key)
    x = jax.random.normal(kx, (batch, input_neurons), jnp.float32)
    params = init_params(key, input_neurons, hidden_neurons, output_neurons)

    # One-time weight/bias padding + bf16 cast (hoisted out of the forward path).
    prepared = prepare_params(params)

    out = simple_network_forward(x, prepared)
    out = jax.block_until_ready(out)

    ref = _reference_forward(x, params)
    ref_bf16 = ref.astype(jnp.bfloat16).astype(out.dtype)   # kernel stores bf16
    assert out.shape == (batch, output_neurons)
    err = jnp.max(jnp.abs(out - ref_bf16))
    assert jnp.allclose(out, ref_bf16, atol=2e-2, rtol=2e-2), f"max err {err}"

    print("KERNEL_OK")
</pallas_src>

<mosaic_0001>
module attributes {stable_mosaic.version = 11 : i64} {
  func.func @_mlp_kernel(%arg0: i32, %arg1: memref<16x32xf32, #tpu.memory_space<vmem>>, %arg2: memref<32x128xbf16, #tpu.memory_space<vmem>>, %arg3: memref<1x128xf32, #tpu.memory_space<vmem>>, %arg4: memref<128x128xbf16, #tpu.memory_space<vmem>>, %arg5: memref<1x128xf32, #tpu.memory_space<vmem>>, %arg6: memref<128x128xbf16, #tpu.memory_space<vmem>>, %arg7: memref<1x128xf32, #tpu.memory_space<vmem>>, %arg8: memref<128x128xbf16, #tpu.memory_space<vmem>>, %arg9: memref<1x128xf32, #tpu.memory_space<vmem>>, %arg10: memref<16x128xbf16, #tpu.memory_space<vmem>>) attributes {dimension_semantics = [#tpu.dimension_semantics<parallel>], iteration_bounds = array<i64: 1>, scalar_prefetch = 0 : i64, scratch_operands = 0 : i64, tpu.core_type = #tpu.core_type<tc>, window_params = [{transform_indices = @transform_0, window_bounds = array<i64: 16, 32>}, {pipeline_mode = #tpu.pipeline_mode<synchronous>, transform_indices = @transform_1, window_bounds = array<i64: 32, 128>}, {pipeline_mode = #tpu.pipeline_mode<synchronous>, transform_indices = @transform_2, window_bounds = array<i64: 1, 128>}, {pipeline_mode = #tpu.pipeline_mode<synchronous>, transform_indices = @transform_3, window_bounds = array<i64: 128, 128>}, {pipeline_mode = #tpu.pipeline_mode<synchronous>, transform_indices = @transform_4, window_bounds = array<i64: 1, 128>}, {pipeline_mode = #tpu.pipeline_mode<synchronous>, transform_indices = @transform_5, window_bounds = array<i64: 128, 128>}, {pipeline_mode = #tpu.pipeline_mode<synchronous>, transform_indices = @transform_6, window_bounds = array<i64: 1, 128>}, {pipeline_mode = #tpu.pipeline_mode<synchronous>, transform_indices = @transform_7, window_bounds = array<i64: 128, 128>}, {pipeline_mode = #tpu.pipeline_mode<synchronous>, transform_indices = @transform_8, window_bounds = array<i64: 1, 128>}, {transform_indices = @transform_9, window_bounds = array<i64: 16, 128>}]} {
    %c0 = arith.constant 0 : index
    %c0_0 = arith.constant 0 : index
    %0 = vector.load %arg1[%c0, %c0_0] : memref<16x32xf32, #tpu.memory_space<vmem>>, vector<16x32xf32>
    %1 = arith.truncf %0 : vector<16x32xf32> to vector<16x32xbf16>
    %c0_1 = arith.constant 0 : index
    %c0_2 = arith.constant 0 : index
    %2 = vector.load %arg2[%c0_1, %c0_2] : memref<32x128xbf16, #tpu.memory_space<vmem>>, vector<32x128xbf16>
    %cst = arith.constant dense<0.000000e+00> : vector<16x128xf32>
    %3 = tpu.matmul %1, %2, %cst {dimension_numbers = #tpu.dot_dimension_numbers<[1], [0], [0], [1], [0, 0, 1, 1], [], []>} : vector<16x32xbf16>, vector<32x128xbf16>, vector<16x128xf32> -> vector<16x128xf32>
    %c0_3 = arith.constant 0 : index
    %c0_4 = arith.constant 0 : index
    %4 = vector.load %arg3[%c0_3, %c0_4] : memref<1x128xf32, #tpu.memory_space<vmem>>, vector<1x128xf32>
    %5 = vector.broadcast %4 : vector<1x128xf32> to vector<16x128xf32>
    %6 = arith.addf %3, %5 : vector<16x128xf32>
    %cst_5 = arith.constant 0.000000e+00 : f32
    %7 = vector.broadcast %cst_5 : f32 to vector<16x128xf32>
    %8 = arith.maximumf %6, %7 : vector<16x128xf32>
    %9 = arith.truncf %8 : vector<16x128xf32> to vector<16x128xbf16>
    %c0_6 = arith.constant 0 : index
    %c0_7 = arith.constant 0 : index
    %10 = vector.load %arg4[%c0_6, %c0_7] : memref<128x128xbf16, #tpu.memory_space<vmem>>, vector<128x128xbf16>
    %cst_8 = arith.constant dense<0.000000e+00> : vector<16x128xf32>
    %11 = tpu.matmul %9, %10, %cst_8 {dimension_numbers = #tpu.dot_dimension_numbers<[1], [0], [0], [1], [0, 0, 1, 1], [], []>} : vector<16x128xbf16>, vector<128x128xbf16>, vector<16x128xf32> -> vector<16x128xf32>
    %c0_9 = arith.constant 0 : index
    %c0_10 = arith.constant 0 : index
    %12 = vector.load %arg5[%c0_9, %c0_10] : memref<1x128xf32, #tpu.memory_space<vmem>>, vector<1x128xf32>
    %13 = vector.broadcast %12 : vector<1x128xf32> to vector<16x128xf32>
    %14 = arith.addf %11, %13 : vector<16x128xf32>
    %cst_11 = arith.constant 0.000000e+00 : f32
    %15 = vector.broadcast %cst_11 : f32 to vector<16x128xf32>
    %16 = arith.maximumf %14, %15 : vector<16x128xf32>
    %17 = arith.truncf %16 : vector<16x128xf32> to vector<16x128xbf16>
    %c0_12 = arith.constant 0 : index
    %c0_13 = arith.constant 0 : index
    %18 = vector.load %arg6[%c0_12, %c0_13] : memref<128x128xbf16, #tpu.memory_space<vmem>>, vector<128x128xbf16>
    %cst_14 = arith.constant dense<0.000000e+00> : vector<16x128xf32>
    %19 = tpu.matmul %17, %18, %cst_14 {dimension_numbers = #tpu.dot_dimension_numbers<[1], [0], [0], [1], [0, 0, 1, 1], [], []>} : vector<16x128xbf16>, vector<128x128xbf16>, vector<16x128xf32> -> vector<16x128xf32>
    %c0_15 = arith.constant 0 : index
    %c0_16 = arith.constant 0 : index
    %20 = vector.load %arg7[%c0_15, %c0_16] : memref<1x128xf32, #tpu.memory_space<vmem>>, vector<1x128xf32>
    %21 = vector.broadcast %20 : vector<1x128xf32> to vector<16x128xf32>
    %22 = arith.addf %19, %21 : vector<16x128xf32>
    %cst_17 = arith.constant 0.000000e+00 : f32
    %23 = vector.broadcast %cst_17 : f32 to vector<16x128xf32>
    %24 = arith.maximumf %22, %23 : vector<16x128xf32>
    %25 = arith.truncf %24 : vector<16x128xf32> to vector<16x128xbf16>
    %c0_18 = arith.constant 0 : index
    %c0_19 = arith.constant 0 : index
    %26 = vector.load %arg8[%c0_18, %c0_19] : memref<128x128xbf16, #tpu.memory_space<vmem>>, vector<128x128xbf16>
    %cst_20 = arith.constant dense<0.000000e+00> : vector<16x128xf32>
    %27 = tpu.matmul %25, %26, %cst_20 {dimension_numbers = #tpu.dot_dimension_numbers<[1], [0], [0], [1], [0, 0, 1, 1], [], []>} : vector<16x128xbf16>, vector<128x128xbf16>, vector<16x128xf32> -> vector<16x128xf32>
    %c0_21 = arith.constant 0 : index
    %c0_22 = arith.constant 0 : index
    %28 = vector.load %arg9[%c0_21, %c0_22] : memref<1x128xf32, #tpu.memory_space<vmem>>, vector<1x128xf32>
    %29 = vector.broadcast %28 : vector<1x128xf32> to vector<16x128xf32>
    %30 = arith.addf %27, %29 : vector<16x128xf32>
    %31 = arith.truncf %30 : vector<16x128xf32> to vector<16x128xbf16>
    %c0_23 = arith.constant 0 : index
    %c0_24 = arith.constant 0 : index
    %32 = vector.load %arg10[%c0_23, %c0_24] : memref<16x128xbf16, #tpu.memory_space<vmem>>, vector<16x128xbf16>
    tpu.vector_store %arg10[%c0_23, %c0_24], %31 {strides = array<i32>} : memref<16x128xbf16, #tpu.memory_space<vmem>>, vector<16x128xbf16>,
    return
  }
  func.func @transform_0(%arg0: i32) -> (i32, i32) {
    %c0_i32 = arith.constant 0 : i32
    %c0_i32_0 = arith.constant 0 : i32
    return %arg0, %c0_i32 : i32, i32
  }
  func.func @transform_1(%arg0: i32) -> (i32, i32) {
    %c0_i32 = arith.constant 0 : i32
    %c0_i32_0 = arith.constant 0 : i32
    %c0_i32_1 = arith.constant 0 : i32
    return %c0_i32, %c0_i32_0 : i32, i32
  }
  func.func @transform_2(%arg0: i32) -> (i32, i32) {
    %c0_i32 = arith.constant 0 : i32
    %c0_i32_0 = arith.constant 0 : i32
    %c0_i32_1 = arith.constant 0 : i32
    return %c0_i32, %c0_i32_0 : i32, i32
  }
  func.func @transform_3(%arg0: i32) -> (i32, i32) {
    %c0_i32 = arith.constant 0 : i32
    %c0_i32_0 = arith.constant 0 : i32
    %c0_i32_1 = arith.constant 0 : i32
    return %c0_i32, %c0_i32_0 : i32, i32
  }
  func.func @transform_4(%arg0: i32) -> (i32, i32) {
    %c0_i32 = arith.constant 0 : i32
    %c0_i32_0 = arith.constant 0 : i32
    %c0_i32_1 = arith.constant 0 : i32
    return %c0_i32, %c0_i32_0 : i32, i32
  }
  func.func @transform_5(%arg0: i32) -> (i32, i32) {
    %c0_i32 = arith.constant 0 : i32
    %c0_i32_0 = arith.constant 0 : i32
    %c0_i32_1 = arith.constant 0 : i32
    return %c0_i32, %c0_i32_0 : i32, i32
  }
  func.func @transform_6(%arg0: i32) -> (i32, i32) {
    %c0_i32 = arith.constant 0 : i32
    %c0_i32_0 = arith.constant 0 : i32
    %c0_i32_1 = arith.constant 0 : i32
    return %c0_i32, %c0_i32_0 : i32, i32
  }
  func.func @transform_7(%arg0: i32) -> (i32, i32) {
    %c0_i32 = arith.constant 0 : i32
    %c0_i32_0 = arith.constant 0 : i32
    %c0_i32_1 = arith.constant 0 : i32
    return %c0_i32, %c0_i32_0 : i32, i32
  }
  func.func @transform_8(%arg0: i32) -> (i32, i32) {
    %c0_i32 = arith.constant 0 : i32
    %c0_i32_0 = arith.constant 0 : i32
    %c0_i32_1 = arith.constant 0 : i32
    return %c0_i32, %c0_i32_0 : i32, i32
  }
  func.func @transform_9(%arg0: i32) -> (i32, i32) {
    %c0_i32 = arith.constant 0 : i32
    %c0_i32_0 = arith.constant 0 : i32
    return %arg0, %c0_i32 : i32, i32
  }
}

</mosaic_0001>

<bundles_post_ra>
// kernel: tpu_custom_call.1
= control target key start
LH: loop header
LB: loop body
LE: loop exit
PB: predicated region body
PF: predicated region fallthrough
CT: control target
= control target key end

     0   :  { %14 = vsyncpa [#allocation3], 0  ;;  %s840_s0 = inlined_call_operand.hbm [shape: f32[16,32], index: 0, kind: input, shape index: {}]   ;;  %s841_s1 = inlined_call_operand.hbm [shape: bf16[32,128], index: 1, kind: input, shape index: {}]   ;;  %s842_s2 = inlined_call_operand.vmem [shape: f32[1,128], index: 2, kind: input, shape index: {}]   ;;  %s843_s3 = inlined_call_operand.hbm [shape: bf16[128,128], index: 3, kind: input, shape index: {}]   ;;  %s844_s4 = inlined_call_operand.vmem [shape: f32[1,128], index: 4, kind: input, shape index: {}]   ;;  %s845_s5 = inlined_call_operand.hbm [shape: bf16[128,128], index: 5, kind: input, shape index: {}]   ;;  %s846_s6 = inlined_call_operand.vmem [shape: f32[1,128], index: 6, kind: input, shape index: {}]   ;;  %s847_s7 = inlined_call_operand.hbm [shape: bf16[128,128], index: 7, kind: input, shape index: {}]   ;;  %s848_s8 = inlined_call_operand.vmem [shape: f32[1,128], index: 8, kind: input, shape index: {}]   ;;  %s849_s9 = inlined_call_operand.hbm [shape: bf16[16,128], index: 9, kind: output, shape index: {}]  }
   0x1   :  { %15 = vsyncpa [#allocation6], 0 }
   0x2   :  { %16 = vsyncpa [#allocation9], 0  ;;  %s35_s11 = sshll.u32 %s841_s1, 4  ;;  %s36_s11 = int_to_ptr.hbm [resolvable:$true] %s35_s11 }
   0x3   :  { %17 = vsyncpa [#allocation4], 0  ;;  %s735_s12 = smov [#allocation5]   ;;  %s65_s16 = sshll.u32 %s845_s5, 4  ;;  %s66_s16 = int_to_ptr.hbm [resolvable:$true] %s65_s16 }
   0x4   :  { %s37_s13 = sshll.u32 %s735_s12, 4  ;;  %s736_s17 = smov 64   ;;  %s38_s13 = int_to_ptr.vmem [resolvable:$true] %s37_s13 }
   0x5   :  { %s737_s18 = smov 4   ;;  %s738_s19 = smov [#allocation8]  }
   0x6   :  { %43 = dma.hbm_to_vmem [thread:$0]  %s36_s11, 256, %s38_s13, [#allocation6], %s736_s17, %s736_s17, %s737_s18  }
   0x7   :  { %s67_s20 = sshll.u32 %s738_s19, 4  ;;  %s22_s22 = sshll.u32 %s840_s0, 4  ;;  %s68_s20 = int_to_ptr.vmem [resolvable:$true] %s67_s20  ;;  %s23_s22 = int_to_ptr.hbm [resolvable:$true] %s22_s22 }
   0x8   :  { %73 = dma.hbm_to_vmem [thread:$0]  %s66_s16, 1024, %s68_s20, [#allocation9], %s736_s17, %s736_s17, %s737_s18  }
   0x9   :  { %s739_s5 = smov [#allocation2]   ;;  %s50_s26 = sshll.u32 %s843_s3, 4  ;;  %s51_s26 = int_to_ptr.hbm [resolvable:$true] %s50_s26 }
   0xa   :  { %s24_s23 = sshll.u32 %s739_s5, 4  ;;  %s740_s27 = smov 128   ;;  %s25_s23 = int_to_ptr.vmem [resolvable:$true] %s24_s23 }
   0xb   :  { %s741_s28 = smov 8   ;;  %s742_s29 = smov [#allocation7]  }
   0xc   :  { %30 = dma.hbm_to_vmem [thread:$0]  %s23_s22, 256, %s25_s23, [#allocation3], %s740_s27, %s740_s27, %s741_s28  }
   0xd   :  { %s52_s30 = sshll.u32 %s742_s29, 4  ;;  %s80_s11 = sshll.u32 %s847_s7, 4  ;;  %s53_s30 = int_to_ptr.vmem [resolvable:$true] %s52_s30  ;;  %s81_s11 = int_to_ptr.hbm [resolvable:$true] %s80_s11 }
   0xe   :  { %58 = dma.hbm_to_vmem [thread:$0]  %s51_s26, 1024, %s53_s30, [#allocation6], %s736_s17, %s736_s17, %s737_s18  }
   0xf   :  { %s743_s12 = smov [#allocation10]  }
  0x10   :  { %s82_s13 = sshll.u32 %s743_s12, 4  ;;  %s83_s13 = int_to_ptr.vmem [resolvable:$true] %s82_s13 }
  0x11   :  { %88 = dma.hbm_to_vmem [thread:$0]  %s81_s11, 1024, %s83_s13, [#allocation9], %s736_s17, %s736_s17, %s737_s18  }
  0x12   :  { %727 = dma.done.wait [#allocation3], 256  }
  0x13   :  { %728 = vsyncadd [#allocation3], 4294967040 }
  0x14   :  { %729 = dma.done.wait [#allocation6], 1280  }
  0x15   :  { %730 = vsyncadd [#allocation6], 4294966016 }
  0x16   :  { %731 = dma.done.wait [#allocation9], 2048  }
  0x17   :  { %732 = vsyncadd [#allocation9], 4294965248  ;;  %v539_v0 = vld [vmem:[#allocation5 + $0x8] sm:$0xff]  ;;  %v538_v1 = vld [vmem:[#allocation5] sm:$0xff]  ;;  %vm135_vm0 = vcmask 261120   ;;  %s744_s20 = smov [#allocation11]  }
  0x18   :  { %v547_v2 = vld [vmem:[#allocation7 + $0x38] sm:$0xff]  ;;  %145 = vmatpush.bf16.msra.mxu0 %v539_v0  ;;  %v112_v3 = vld [vmem:[#allocation2] sm:$0xff]  ;;  %v113_v4 = vld [vmem:[#allocation2 + $0x8] sm:$0xff]  ;;  %s416_s21 = sshll.u32 %s744_s20, 4  ;;  %s418_s5 = sshll.u32 %s849_s9, 4  ;;  %s417_s21 = int_to_ptr.vmem [resolvable:$true] %s416_s21  ;;  %s419_s5 = int_to_ptr.hbm [resolvable:$true] %s418_s5 }
  0x19   :  { %224 = vmatpush.bf16.msra.mxu1 %v547_v2  ;;  %v546_v5 = vld [vmem:[#allocation7 + $0x30] sm:$0xff]  ;;  %v114_v6 = vpack.c.bf16 %v113_v4, %v112_v3  ;;  %v545_v7 = vld [vmem:[#allocation7 + $0x28] sm:$0xff]  ;;  %v544_v8 = vld [vmem:[#allocation7 + $0x20] sm:$0xff] }
  0x1a   :  { %v543_v9 = vld [vmem:[#allocation7 + $0x18] sm:$0xff]  ;;  %v542_v10 = vld [vmem:[#allocation7 + $0x10] sm:$0xff]  ;;  %v541_v11 = vld [vmem:[#allocation7 + $0x8] sm:$0xff] }
  0x1b   :  { %v540_v12 = vld [vmem:[#allocation7] sm:$0xff]  ;;  %v555_v13 = vld [vmem:[#allocation8 + $0x38] sm:$0xff]  ;;  %v554_v14 = vld [vmem:[#allocation8 + $0x30] sm:$0xff] }
  0x1c   :  { %146 = vmatpush.bf16.msra.mxu0 %v538_v1  ;;  %309 = vmatpush.bf16.msra.mxu2 %v555_v13  ;;  %v553_v15 = vld [vmem:[#allocation8 + $0x28] sm:$0xff]  ;;  %v552_v16 = vld [vmem:[#allocation8 + $0x20] sm:$0xff]  ;;  %v551_v25 = vld [vmem:[#allocation8 + $0x18] sm:$0xff] }
  0x1d   :  { %225 = vmatpush.bf16.msra.mxu1 %v546_v5  ;;  %v579_v18 = vld [vmem:[%s842_s2] ss:$0 sm:$0xff]  ;;  %v550_v26 = vld [vmem:[#allocation8 + $0x10] sm:$0xff]  ;;  %v549_v27 = vld [vmem:[#allocation8 + $0x8] sm:$0xff] }
  0x1e   :  { %v548_v28 = vld [vmem:[#allocation8] sm:$0xff]  ;;  %v563_v29 = vld [vmem:[#allocation10 + $0x38] sm:$0xff]  ;;  %v562_v30 = vld [vmem:[#allocation10 + $0x30] sm:$0xff] }
  0x1f   :  { %441 = vmatmul.msk.bf16.vlgmr.msra.gmra.mxu0 %vm135_vm0, %v114_v6  ;;  %394 = vmatpush.bf16.msra.mxu3 %v563_v29  ;;  %v561_v31 = vld [vmem:[#allocation10 + $0x28] sm:$0xff]  ;;  %v560_v32 = vld [vmem:[#allocation10 + $0x20] sm:$0xff]  ;;  %v559_v41 = vld [vmem:[#allocation10 + $0x18] sm:$0xff] }
  0x20   :  { %310 = vmatpush.bf16.msra.mxu2 %v554_v14  ;;  %v580_v34 = vld [vmem:[%s844_s4] ss:$0 sm:$0xff]  ;;  %v558_v42 = vld [vmem:[#allocation10 + $0x10] sm:$0xff]  ;;  %v557_v43 = vld [vmem:[#allocation10 + $0x8] sm:$0xff] }
  0x21   :  { %226 = vmatpush.bf16.msra.mxu1 %v545_v7  ;;  %v556_v44 = vld [vmem:[#allocation10] sm:$0xff] }
  0x22   :  { %v581_v46 = vld [vmem:[%s846_s6] ss:$0 sm:$0xff] }
  0x23   :  { %395 = vmatpush.bf16.msra.mxu3 %v562_v30  ;;  %v582_v54 = vld [vmem:[%s848_s8] ss:$0 sm:$0xff] }
  0x24   :  { %311 = vmatpush.bf16.msra.mxu2 %v553_v15 }
  0x25   :  { %227 = vmatpush.bf16.msra.mxu1 %v544_v8 }
  0x27   :  { %396 = vmatpush.bf16.msra.mxu3 %v561_v31 }
  0x28   :  { %312 = vmatpush.bf16.msra.mxu2 %v552_v16 }
  0x29   :  { %228 = vmatpush.bf16.msra.mxu1 %v543_v9 }
  0x2b   :  { %397 = vmatpush.bf16.msra.mxu3 %v560_v32 }
  0x2c   :  { %313 = vmatpush.bf16.msra.mxu2 %v551_v25 }
  0x2d   :  { %229 = vmatpush.bf16.msra.mxu1 %v542_v10 }
  0x2f   :  { %398 = vmatpush.bf16.msra.mxu3 %v559_v41 }
  0x30   :  { %314 = vmatpush.bf16.msra.mxu2 %v550_v26 }
  0x31   :  { %230 = vmatpush.bf16.msra.mxu1 %v541_v11 }
  0x33   :  { %399 = vmatpush.bf16.msra.mxu3 %v558_v42 }
  0x34   :  { %315 = vmatpush.bf16.msra.mxu2 %v549_v27 }
  0x35   :  { %231 = vmatpush.bf16.msra.mxu1 %v540_v12 }
  0x37   :  { %400 = vmatpush.bf16.msra.mxu3 %v557_v43 }
  0x38   :  { %316 = vmatpush.bf16.msra.mxu2 %v548_v28 }
  0x3b   :  { %401 = vmatpush.bf16.msra.mxu3 %v556_v44 }
  0x9c   :  { %v148_v17 = vpop.f32.mrf.mxu0 }
  0x9d   :  { %v149_v19 = vadd.f32 %v579_v18, %v148_v17 }
  0x9f   :  { %v153_v22 = vmax.f32 %v149_v19, 0.0 }
  0xa4   :  { %v150_v20 = vpop.f32.mrf.mxu0 }
  0xa5   :  { %v151_v21 = vadd.f32 %v579_v18, %v150_v20 }
  0xa7   :  { %v154_v23 = vmax.f32 %v151_v21, 0.0 }
  0xa9   :  { %v155_v24 = vpack.c.bf16 %v154_v23, %v153_v22 }
  0xab   :  { %232 = vmatmul.bf16.vlgmr.msra.gmra.mxu1 %v155_v24 }
 0x128   :  { %v233_v33 = vpop.f32.mrf.mxu1 }
 0x129   :  { %v234_v35 = vadd.f32 %v580_v34, %v233_v33 }
 0x12b   :  { %v238_v38 = vmax.f32 %v234_v35, 0.0 }
 0x130   :  { %v235_v36 = vpop.f32.mrf.mxu1 }
 0x131   :  { %v236_v37 = vadd.f32 %v580_v34, %v235_v36 }
 0x133   :  { %v239_v39 = vmax.f32 %v236_v37, 0.0 }
 0x135   :  { %v240_v40 = vpack.c.bf16 %v239_v39, %v238_v38 }
 0x137   :  { %317 = vmatmul.bf16.vlgmr.msra.gmra.mxu2 %v240_v40 }
 0x1ba   :  { %v318_v45 = vpop.f32.mrf.mxu2 }
 0x1bb   :  { %v319_v47 = vadd.f32 %v581_v46, %v318_v45 }
 0x1bd   :  { %v323_v50 = vmax.f32 %v319_v47, 0.0 }
 0x1c2   :  { %v320_v48 = vpop.f32.mrf.mxu2 }
 0x1c3   :  { %v321_v49 = vadd.f32 %v581_v46, %v320_v48 }
 0x1c5   :  { %v324_v51 = vmax.f32 %v321_v49, 0.0 }
 0x1c7   :  { %v325_v52 = vpack.c.bf16 %v324_v51, %v323_v50 }
 0x1c9   :  { %402 = vmatmul.bf16.vlgmr.msra.gmra.mxu3 %v325_v52 }
 0x24c   :  { %v403_v53 = vpop.f32.mrf.mxu3 }
 0x24d   :  { %v404_v56 = vadd.f32 %v582_v54, %v403_v53 }
 0x254   :  { %v405_v55 = vpop.f32.mrf.mxu3 }
 0x255   :  { %v406_v57 = vadd.f32 %v582_v54, %v405_v55 }
 0x257   :  { %v567_v58 = vpack.c.bf16 %v406_v57, %v404_v56 }
 0x259   :  { %568 = vst [vmem:[#allocation11] sm:$0xff] %v567_v58  }
 0x25a   :  { %424 = dma.vmem_to_hbm [thread:$0]  %s417_s21, 128, %s419_s5, [#allocation4], %s736_s17, %s736_s17, %s737_s18  }
 0x25b   :  { %733 = dma.done.wait [#allocation4], 128  }
 0x25c   :  { %734 = vsyncadd [#allocation4], 4294967168 }
 0x25d   :  { %429 = vsyncpa [#allocation3], 1 }
 0x25e   :  { %430 = vsyncpa [#allocation6], 1 }
 0x25f   :  { %431 = vsyncpa [#allocation9], 1 }
 0x260   :  { %432 = vsyncpa [#allocation4], 1 }

</bundles_post_ra>
